<compile_context>
chip_gen: v6e
topology: v6e:2x2x1
jax: 0.10.0
libtpu: 0.0.40
codegen_flags: <defaults>
</compile_context>

<pallas_src>
import functools

import jax
import jax.numpy as jnp
from jax import lax
from jax.experimental import pallas as pl
from jax.experimental.pallas import tpu as pltpu


def _linear_dfa_kernel(x_ref, w_ref, o_ref):
    """One (tm, tn) output tile; reduce over the innermost K grid axis.

    x_ref: (tm, tk)   activations
    w_ref: (tn, tk)   weight tile in its native (out_features, in_features)
                      layout -- no host-side transpose.
    o_ref: (tm, tn)   f32 output tile, resident across the K axis
                      (its block index does not depend on k), used directly
                      as the accumulator.
    """
    @pl.when(pl.program_id(2) == 0)
    def _():
        o_ref[...] = jnp.zeros_like(o_ref)

    o_ref[...] += lax.dot_general(
        x_ref[...],
        w_ref[...],
        dimension_numbers=(((1,), (1,)), ((), ())),  # contract K with K
        preferred_element_type=jnp.float32,
    )


def _pick_tile(dim, cap, align):
    """Largest tile t <= cap with dim % t == 0, preferring multiples of
    `align`; if dim already fits under the cap, use the full dim."""
    if dim <= cap:
        return dim
    fallback = dim
    for t in range(cap, 0, -1):
        if dim % t == 0:
            if t % align == 0:
                return t
            if fallback == dim:
                fallback = t
    return fallback


@functools.partial(jax.jit, static_argnames=("tm", "tn", "tk"))
def linear_dfa_forward(x, weight, *, tm=None, tn=None, tk=None):
    """y = x @ weight.T  (LinearDFA.forward with bias=None, its default).

    x:      (B, in_features)            float32
    weight: (out_features, in_features) float32  -- torch.nn.Linear layout
    """
    B, K = x.shape
    N, K2 = weight.shape
    assert K == K2, "in_features mismatch"

    # Bounded, alignment-aware tile defaults (safe on v5e/v6e/v7x VMEM; tk up
    # to 512 to fill the 2x256^2 MXU on v6e/v7x and amortize per-step cost).
    tm = _pick_tile(B, 512, 8) if tm is None else tm
    tn = _pick_tile(N, 512, 128) if tn is None else tn
    tk = _pick_tile(K, 512, 128) if tk is None else tk

    assert B % tm == 0 and N % tn == 0 and K % tk == 0
    assert tm % 8 == 0 or tm == B
    assert tn % 128 == 0 or tn == N
    assert tk % 128 == 0 or tk == K

    grid = (B // tm, N // tn, K // tk)

    # Double-buffered input blocks + resident f32 output tile, with headroom;
    # clamp to the v7x physical ceiling (64 MiB) and a sane floor.
    tile_bytes = 2 * (tm * tk + tn * tk) * 4 + tm * tn * 4
    vmem_limit = min(max(int(tile_bytes * 2.5), 16 << 20), 64 << 20)

    flops = 2 * B * N * K
    bytes_accessed = (B * K + N * K + B * N) * 4

    return pl.pallas_call(
        _linear_dfa_kernel,
        out_shape=jax.ShapeDtypeStruct((B, N), jnp.float32),
        grid_spec=pltpu.PrefetchScalarGridSpec(
            num_scalar_prefetch=0,
            grid=grid,
            in_specs=[
                pl.BlockSpec((tm, tk), lambda i, j, k: (i, k)),
                # weight kept in native (out_features, in_features) layout
                pl.BlockSpec((tn, tk), lambda i, j, k: (j, k)),
            ],
            out_specs=pl.BlockSpec((tm, tn), lambda i, j, k: (i, j)),
        ),
        compiler_params=pltpu.CompilerParams(
            dimension_semantics=("parallel", "parallel", "arbitrary"),
            vmem_limit_bytes=vmem_limit,
        ),
        cost_estimate=pl.CostEstimate(
            flops=flops, transcendentals=0, bytes_accessed=bytes_accessed
        ),
    )(x, weight)
    # TODO(synk): LinearDFA defaults to bias=None; an optional bias would be a
    # trivial epilogue add at k == num_programs(2)-1, omitted here.


def kaiming_uniform(key, out_features, in_features):
    """torch.nn.init.kaiming_uniform_ defaults: a=0, fan_in, leaky_relu."""
    gain = jnp.sqrt(2.0)                      # gain for leaky_relu with a=0
    bound = gain * jnp.sqrt(3.0 / in_features)
    return jax.random.uniform(
        key, (out_features, in_features), jnp.float32, -bound, bound
    )


if __name__ == "__main__":
    # Small shapes consistent with LinearDFA(in_features, out_features, ...)
    batch = 8
    in_features = 256
    out_features = 128

    key = jax.random.PRNGKey(0)
    kx, kw = jax.random.split(key)

    x = jax.random.normal(kx, (batch, in_features), jnp.float32)
    weight = kaiming_uniform(kw, out_features, in_features)
    # TODO(synk): random_matrix / expo / error_layer only participate in the
    # DFA backward pass (autograd.Function.backward), not the forward.

    y = linear_dfa_forward(x, weight)
    y = jax.block_until_ready(y)

    y_ref = x @ weight.T
    assert y.shape == (batch, out_features)
    assert jnp.allclose(y, y_ref, atol=1e-4, rtol=1e-4)

    print("KERNEL_OK")
</pallas_src>

<mosaic_0001>
module attributes {stable_mosaic.version = 11 : i64} {
  func.func @_linear_dfa_kernel(%arg0: i32, %arg1: i32, %arg2: i32, %arg3: memref<8x256xf32, #tpu.memory_space<vmem>>, %arg4: memref<128x256xf32, #tpu.memory_space<vmem>>, %arg5: memref<8x128xf32, #tpu.memory_space<vmem>>) attributes {dimension_semantics = [#tpu.dimension_semantics<parallel>, #tpu.dimension_semantics<parallel>, #tpu.dimension_semantics<arbitrary>], iteration_bounds = array<i64: 1, 1, 1>, scalar_prefetch = 0 : i64, scratch_operands = 0 : i64, tpu.core_type = #tpu.core_type<tc>, window_params = [{transform_indices = @transform_0, window_bounds = array<i64: 8, 256>}, {transform_indices = @transform_1, window_bounds = array<i64: 128, 256>}, {transform_indices = @transform_2, window_bounds = array<i64: 8, 128>}]} {
    %c0_i32 = arith.constant 0 : i32
    %0 = arith.cmpi eq, %arg2, %c0_i32 : i32
    %1 = arith.extui %0 : i1 to i32
    %c0_i32_0 = arith.constant 0 : i32
    %2 = arith.cmpi ne, %1, %c0_i32_0 : i32
    scf.if %2 {
      %cst_8 = arith.constant 0.000000e+00 : f32
      %9 = vector.broadcast %cst_8 : f32 to vector<8x128xf32>
      %c0_9 = arith.constant 0 : index
      %c0_10 = arith.constant 0 : index
      %10 = vector.load %arg5[%c0_9, %c0_10] : memref<8x128xf32, #tpu.memory_space<vmem>>, vector<8x128xf32>
      tpu.vector_store %arg5[%c0_9, %c0_10], %9 {strides = array<i32>} : memref<8x128xf32, #tpu.memory_space<vmem>>, vector<8x128xf32>,
    } else {
    }
    %c0 = arith.constant 0 : index
    %c0_1 = arith.constant 0 : index
    %3 = vector.load %arg5[%c0, %c0_1] : memref<8x128xf32, #tpu.memory_space<vmem>>, vector<8x128xf32>
    %c0_2 = arith.constant 0 : index
    %c0_3 = arith.constant 0 : index
    %4 = vector.load %arg3[%c0_2, %c0_3] : memref<8x256xf32, #tpu.memory_space<vmem>>, vector<8x256xf32>
    %c0_4 = arith.constant 0 : index
    %c0_5 = arith.constant 0 : index
    %5 = vector.load %arg4[%c0_4, %c0_5] : memref<128x256xf32, #tpu.memory_space<vmem>>, vector<128x256xf32>
    %cst = arith.constant dense<0.000000e+00> : vector<8x128xf32>
    %6 = tpu.matmul %4, %5, %cst {dimension_numbers = #tpu.dot_dimension_numbers<[1], [1], [0], [0], [0, 0, 1, 0], [], []>} : vector<8x256xf32>, vector<128x256xf32>, vector<8x128xf32> -> vector<8x128xf32>
    %7 = arith.addf %3, %6 : vector<8x128xf32>
    %c0_6 = arith.constant 0 : index
    %c0_7 = arith.constant 0 : index
    %8 = vector.load %arg5[%c0_6, %c0_7] : memref<8x128xf32, #tpu.memory_space<vmem>>, vector<8x128xf32>
    tpu.vector_store %arg5[%c0_6, %c0_7], %7 {strides = array<i32>} : memref<8x128xf32, #tpu.memory_space<vmem>>, vector<8x128xf32>,
    return
  }
  func.func @transform_0(%arg0: i32, %arg1: i32, %arg2: i32) -> (i32, i32) {
    %c0_i32 = arith.constant 0 : i32
    return %arg0, %arg2 : i32, i32
  }
  func.func @transform_1(%arg0: i32, %arg1: i32, %arg2: i32) -> (i32, i32) {
    %c0_i32 = arith.constant 0 : i32
    return %arg1, %arg2 : i32, i32
  }
  func.func @transform_2(%arg0: i32, %arg1: i32, %arg2: i32) -> (i32, i32) {
    %c0_i32 = arith.constant 0 : i32
    return %arg0, %arg1 : i32, i32
  }
}

</mosaic_0001>

<bundles_post_ra>
// kernel: linear_dfa_forward.1
= control target key start
LH: loop header
LB: loop body
LE: loop exit
PB: predicated region body
PF: predicated region fallthrough
CT: control target
= control target key end

     0   :  { %7 = vsyncpa [#allocation3], 0  ;;  %s267_s0 = inlined_call_operand.hbm [shape: f32[8,256], index: 0, kind: input, shape index: {}]   ;;  %s268_s1 = inlined_call_operand.hbm [shape: f32[128,256], index: 1, kind: input, shape index: {}]   ;;  %s269_s2 = inlined_call_operand.hbm [shape: f32[8,128], index: 2, kind: output, shape index: {}]  }
   0x1   :  { %8 = vsyncpa [#allocation6], 0 }
   0x2   :  { %9 = vsyncpa [#allocation4], 0  ;;  %s238_s9 = smov [#allocation2]   ;;  %s239_s11 = smov [#allocation5]  }
   0x3   :  { %s16_s10 = sshll.u32 %s238_s9, 4  ;;  %s25_s12 = sshll.u32 %s239_s11, 4  ;;  %s17_s10 = int_to_ptr.vmem [resolvable:$true] %s16_s10  ;;  %s26_s12 = int_to_ptr.vmem [resolvable:$true] %s25_s12 }
   0x4   :  { %s180_s13 = scalar_lea.vmem %s17_s10, 256  ;;  %p185_p1 = scmp.lt.s32.totalorder %s17_s10, %s17_s10 }
   0x5   :  { %p181_p0 = scmp.ne.s32.totalorder %s17_s10, %s180_s13  ;;  %p186_p2 = scmp.lt.s32.totalorder %s180_s13, %s180_s13 }
   0x7   :  { %p187_p3 = por %p186_p2, %p185_p1 }
   0x9   :  { %p188_p4 = pnand %p187_p3, %p181_p0 }
   0xb   :  { %191 = shalt.err (!%p188_p4)
}
   0xc   :  { %19 = dma.hbm_to_vmem [thread:$0]  %s267_s0, 256, %s17_s10, [#allocation3]  }
   0xd   :  { %s200_s16 = scalar_lea.vmem %s26_s12, 4096  ;;  %p205_p6 = scmp.lt.s32.totalorder %s26_s12, %s26_s12 }
   0xe   :  { %p201_p5 = scmp.ne.s32.totalorder %s26_s12, %s200_s16  ;;  %p206_p7 = scmp.lt.s32.totalorder %s200_s16, %s200_s16 }
  0x10   :  { %p207_p8 = por %p206_p7, %p205_p6 }
  0x12   :  { %p208_p9 = pnand %p207_p8, %p201_p5 }
  0x14   :  { %211 = shalt.err (!%p208_p9)
}
  0x15   :  { %s240_s17 = smov 256   ;;  %s241_s18 = smov 16  }
  0x16   :  { %31 = dma.hbm_to_vmem [thread:$0]  %s268_s1, 4096, %s26_s12, [#allocation6], %s240_s17, %s240_s17, %s241_s18  }
  0x17   :  { %232 = dma.done.wait [#allocation3], 256  }
  0x18   :  { %233 = vsyncadd [#allocation3], 4294967040 }
  0x19   :  { %234 = dma.done.wait [#allocation6], 4096  }
  0x1a   :  { %235 = vsyncadd [#allocation6], 4294963200  ;;  %v77_v0 = vld [vmem:[#allocation5 + $0xf8] sm:$0xff]  ;;  %v76_v1 = vld [vmem:[#allocation5 + $0xf0] sm:$0xff]  ;;  %s242_s0 = smov [#allocation7]  }
  0x1b   :  { %v75_v2 = vld [vmem:[#allocation5 + $0xe8] sm:$0xff]  ;;  %78 = vmatprep.subr.mxu0 %v77_v0  ;;  %v74_v3 = vld [vmem:[#allocation5 + $0xe0] sm:$0xff]  ;;  %v73_v4 = vld [vmem:[#allocation5 + $0xd8] sm:$0xff]  ;;  %s156_s1 = sshll.u32 %s242_s0, 4  ;;  %s157_s1 = int_to_ptr.vmem [resolvable:$true] %s156_s1 }
  0x1c   :  { %79 = vmatpush1.xpose.msra.mxu0 %v76_v1  ;;  %v72_v5 = vld [vmem:[#allocation5 + $0xd0] sm:$0xff]  ;;  %v71_v6 = vld [vmem:[#allocation5 + $0xc8] sm:$0xff]  ;;  %v45_v7 = vld [vmem:[#allocation2 + $0x8] sm:$0xff]  ;;  %s212_s21 = scalar_lea.vmem %s157_s1, 128  ;;  %p217_p11 = scmp.lt.s32.totalorder %s157_s1, %s157_s1 }
  0x1d   :  { %80 = vmatprep.subr.mxu0 %v75_v2  ;;  %v70_v8 = vld [vmem:[#allocation5 + $0xc0] sm:$0xff]  ;;  %142 = vmatprep.mubr.f32.mxu0 %v45_v7  ;;  %v69_v9 = vld [vmem:[#allocation5 + $0xb8] sm:$0xff]  ;;  %v68_v10 = vld [vmem:[#allocation5 + $0xb0] sm:$0xff]  ;;  %p213_p10 = scmp.ne.s32.totalorder %s157_s1, %s212_s21  ;;  %p218_p12 = scmp.lt.s32.totalorder %s212_s21, %s212_s21 }
  0x1e   :  { %v67_v11 = vld [vmem:[#allocation5 + $0xa8] sm:$0xff]  ;;  %v66_v12 = vld [vmem:[#allocation5 + $0xa0] sm:$0xff]  ;;  %v65_v13 = vld [vmem:[#allocation5 + $0x98] sm:$0xff] }
  0x1f   :  { %v64_v14 = vld [vmem:[#allocation5 + $0x90] sm:$0xff]  ;;  %v63_v15 = vld [vmem:[#allocation5 + $0x88] sm:$0xff]  ;;  %v62_v16 = vld [vmem:[#allocation5 + $0x80] sm:$0xff]  ;;  %p219_p13 = por %p218_p12, %p217_p11 }
  0x20   :  { %81 = vmatpush1.xpose.msra.mxu0 %v74_v3  ;;  %v61_v17 = vld [vmem:[#allocation5 + $0x78] sm:$0xff]  ;;  %v60_v18 = vld [vmem:[#allocation5 + $0x70] sm:$0xff]  ;;  %v59_v19 = vld [vmem:[#allocation5 + $0x68] sm:$0xff] }
  0x21   :  { %82 = vmatprep.subr.mxu0 %v73_v4  ;;  %v58_v20 = vld [vmem:[#allocation5 + $0x60] sm:$0xff]  ;;  %v57_v21 = vld [vmem:[#allocation5 + $0x58] sm:$0xff]  ;;  %v56_v22 = vld [vmem:[#allocation5 + $0x50] sm:$0xff]  ;;  %p220_p0 = pnand %p219_p13, %p213_p10 }
  0x22   :  { %v55_v23 = vld [vmem:[#allocation5 + $0x48] sm:$0xff]  ;;  %v54_v24 = vld [vmem:[#allocation5 + $0x40] sm:$0xff]  ;;  %v53_v25 = vld [vmem:[#allocation5 + $0x38] sm:$0xff] }
  0x23   :  { %v52_v26 = vld [vmem:[#allocation5 + $0x30] sm:$0xff]  ;;  %v51_v27 = vld [vmem:[#allocation5 + $0x28] sm:$0xff]  ;;  %v50_v28 = vld [vmem:[#allocation5 + $0x20] sm:$0xff] }
  0x24   :  { %83 = vmatpush1.xpose.msra.mxu0 %v72_v5  ;;  %v49_v29 = vld [vmem:[#allocation5 + $0x18] sm:$0xff]  ;;  %v48_v30 = vld [vmem:[#allocation5 + $0x10] sm:$0xff]  ;;  %v47_v31 = vld [vmem:[#allocation5 + $0x8] sm:$0xff] }
  0x25   :  { %84 = vmatprep.subr.mxu0 %v71_v6  ;;  %v46_v32 = vld [vmem:[#allocation5] sm:$0xff]  ;;  %v44_v33 = vld [vmem:[#allocation2] sm:$0xff] }
  0x28   :  { %85 = vmatpush1.xpose.msra.mxu0 %v70_v8 }
  0x29   :  { %86 = vmatprep.subr.mxu0 %v69_v9 }
  0x2c   :  { %87 = vmatpush1.xpose.msra.mxu0 %v68_v10 }
  0x2d   :  { %88 = vmatprep.subr.mxu0 %v67_v11 }
  0x30   :  { %89 = vmatpush1.xpose.msra.mxu0 %v66_v12 }
  0x31   :  { %90 = vmatprep.subr.mxu0 %v65_v13 }
  0x34   :  { %91 = vmatpush1.xpose.msra.mxu0 %v64_v14 }
  0x35   :  { %92 = vmatprep.subr.mxu0 %v63_v15 }
  0x38   :  { %93 = vmatpush1.xpose.msra.mxu0 %v62_v16 }
  0x39   :  { %94 = vmatprep.subr.mxu0 %v61_v17 }
  0x3c   :  { %95 = vmatpush1.xpose.msra.mxu0 %v60_v18 }
  0x3d   :  { %96 = vmatprep.subr.mxu0 %v59_v19 }
  0x40   :  { %97 = vmatpush1.xpose.msra.mxu0 %v58_v20 }
  0x41   :  { %98 = vmatprep.subr.mxu0 %v57_v21 }
  0x44   :  { %99 = vmatpush1.xpose.msra.mxu0 %v56_v22 }
  0x45   :  { %100 = vmatprep.subr.mxu0 %v55_v23 }
  0x48   :  { %101 = vmatpush1.xpose.msra.mxu0 %v54_v24 }
  0x49   :  { %102 = vmatprep.subr.mxu0 %v53_v25 }
  0x4c   :  { %103 = vmatpush1.xpose.msra.mxu0 %v52_v26 }
  0x4d   :  { %104 = vmatprep.subr.mxu0 %v51_v27 }
  0x50   :  { %105 = vmatpush1.xpose.msra.mxu0 %v50_v28 }
  0x51   :  { %106 = vmatprep.subr.mxu0 %v49_v29 }
  0x54   :  { %107 = vmatpush1.xpose.msra.mxu0 %v48_v30 }
  0x55   :  { %108 = vmatprep.subr.mxu0 %v47_v31 }
  0x58   :  { %109 = vmatpush1.xpose.msra.mxu0 %v46_v32 }
  0x5b   :  { %143 = vmatmul.mubr.f32.vlgmr.msra.gmra.mxu0 %v44_v33 }
 0x11b   :  { %v144_v34 = vpop.f32.mrf.mxu0 }
 0x11c   :  { %149 = vst [vmem:[#allocation7] sm:$0xff] %v144_v34 }
 0x11d   :  { %v146_v35 = vpop.f32.mrf.mxu0 }
 0x11e   :  { %223 = shalt.err (!%p220_p0)
}
 0x11f   :  { %159 = dma.vmem_to_hbm [thread:$0]  %s157_s1, 128, %s269_s2, [#allocation4]  }
 0x120   :  { %236 = dma.done.wait [#allocation4], 128  }
 0x121   :  { %237 = vsyncadd [#allocation4], 4294967168 }
 0x122   :  { %163 = vsyncpa [#allocation3], 1 }
 0x123   :  { %164 = vsyncpa [#allocation6], 1 }
 0x124   :  { %165 = vsyncpa [#allocation4], 1 }

</bundles_post_ra>
